<compile_context>
chip_gen: v7x
topology: tpu7x:2x2x1
jax: 0.10.0
libtpu: 0.0.40
codegen_flags: <defaults>
</compile_context>

<pallas_src>
import jax
import jax.numpy as jnp
from jax import lax
from jax.experimental import pallas as pl
from jax.experimental.pallas import tpu as pltpu


def _mlp_kernel(x_ref, w1_ref, b1_ref, w2_ref, b2_ref, w3_ref, b3_ref, o_ref):
    dot_dt = w1_ref.dtype  # matmul operand dtype (f32 default; bf16 also fine)

    # Natural-layout input tile (batch_tile, in); contraction over the last dim
    # of both operands ("transposed rhs" matmul) gives (hidden, batch_tile)
    # directly -> no HBM transpose of x, no in-kernel relayout of a big tile.
    x = x_ref[...].astype(dot_dt)
    z1 = lax.dot_general(
        w1_ref[...], x,
        dimension_numbers=(((1,), (1,)), ((), ())),
        preferred_element_type=jnp.float32) + b1_ref[...]
    h1 = jnp.tanh(z1)                      # f32 activations (v5e-safe, no bf16 EUP)

    # Layer 2: (hidden, hidden) @ (hidden, bt) -> (hidden, bt)
    z2 = jnp.dot(w2_ref[...], h1.astype(dot_dt),
                 preferred_element_type=jnp.float32) + b2_ref[...]
    h2 = jnp.tanh(z2)

    # Output layer: (1, hidden) @ (hidden, bt) -> (1, bt); b3 is an SMEM scalar.
    z3 = jnp.dot(w3_ref[...], h2.astype(dot_dt),
                 preferred_element_type=jnp.float32) + b3_ref[0, 0]

    # sigmoid(z) = 1 / (1 + exp(-z)); reciprocal on the EUP approx path.
    o_ref[...] = pl.reciprocal(1.0 + jnp.exp(-z3), approx=True).astype(o_ref.dtype)


def _round_up(n, m):
    return ((n + m - 1) // m) * m


def two_hidden_layer_nn(x, w1, b1, w2, b2, w3, b3, *,
                        batch_tile=None, matmul_dtype=jnp.float32):
    """Forward pass of TwoHiddenLayerNeuralNet.

    x : (B, input_size) float32
    w1: (hidden, input_size), b1: (hidden,)   -- PyTorch nn.Linear layout
    w2: (hidden, hidden),     b2: (hidden,)
    w3: (1, hidden),          b3: (1,)
    returns (B, 1) float32.
    """
    B, in_size = x.shape
    hidden = w1.shape[0]

    # Lane-aligned batch tiling (multiples of 128); big tiles amortize the
    # ~0.35us per-grid-step overhead on this memory-bound problem.
    if batch_tile is None:
        batch_tile = min(4096, _round_up(B, 128))
    batch_tile = _round_up(batch_tile, 128)
    B_pad = _round_up(B, batch_tile)

    x_in = x
    if B_pad != B:                       # pad batch only when required
        x_in = jnp.pad(x, ((0, B_pad - B), (0, 0)))

    w1c = w1.astype(matmul_dtype)
    w2c = w2.astype(matmul_dtype)
    w3c = w3.astype(matmul_dtype)
    b1c = b1.reshape(hidden, 1).astype(jnp.float32)
    b2c = b2.reshape(hidden, 1).astype(jnp.float32)
    b3c = b3.reshape(1, 1).astype(jnp.float32)

    grid = (B_pad // batch_tile,)
    full = lambda i: (0, 0)   # weights/biases: same (tiny) full block every step

    outT = pl.pallas_call(
        _mlp_kernel,
        out_shape=jax.ShapeDtypeStruct((1, B_pad), jnp.float32),
        grid_spec=pltpu.PrefetchScalarGridSpec(
            num_scalar_prefetch=0,
            grid=grid,
            in_specs=[
                pl.BlockSpec((batch_tile, in_size), lambda i: (i, 0)),  # x tile
                pl.BlockSpec((hidden, in_size), full),                  # W1
                pl.BlockSpec((hidden, 1), full),                        # b1
                pl.BlockSpec((hidden, hidden), full),                   # W2
                pl.BlockSpec((hidden, 1), full),                        # b2
                pl.BlockSpec((1, hidden), full),                        # W3
                pl.BlockSpec(memory_space=pltpu.MemorySpace.SMEM),      # b3 scalar
            ],
            out_specs=pl.BlockSpec((1, batch_tile), lambda i: (0, i)),
        ),
        compiler_params=pltpu.CompilerParams(
            dimension_semantics=("parallel",),   # shardable across v7x TCs
        ),
    )(x_in, w1c, b1c, w2c, b2c, w3c, b3c)

    return jnp.transpose(outT[:, :B])            # (B, 1)


def _reference(x, w1, b1, w2, b2, w3, b3):
    h1 = jnp.tanh(x @ w1.T + b1)
    h2 = jnp.tanh(h1 @ w2.T + b2)
    return jax.nn.sigmoid(h2 @ w3.T + b3)


if __name__ == "__main__":
    key = jax.random.PRNGKey(0)
    batch, input_size, hidden_size = 256, 16, 32

    k = jax.random.split(key, 7)
    x = jax.random.normal(k[0], (batch, input_size), dtype=jnp.float32)

    # Deterministic parameters in PyTorch nn.Linear layout (out_features, in_features).
    s1 = 1.0 / jnp.sqrt(input_size)
    s2 = 1.0 / jnp.sqrt(hidden_size)
    w1 = jax.random.uniform(k[1], (hidden_size, input_size), jnp.float32, -s1, s1)
    b1 = jax.random.uniform(k[2], (hidden_size,), jnp.float32, -s1, s1)
    w2 = jax.random.uniform(k[3], (hidden_size, hidden_size), jnp.float32, -s2, s2)
    b2 = jax.random.uniform(k[4], (hidden_size,), jnp.float32, -s2, s2)
    w3 = jax.random.uniform(k[5], (1, hidden_size), jnp.float32, -s2, s2)
    b3 = jax.random.uniform(k[6], (1,), jnp.float32, -s2, s2)

    # batch_tile=128 -> 2 grid steps: exercises pipelining / the parallel axis.
    out = two_hidden_layer_nn(x, w1, b1, w2, b2, w3, b3, batch_tile=128)
    out = jax.block_until_ready(out)

    ref = _reference(x, w1, b1, w2, b2, w3, b3)
    assert out.shape == (batch, 1)
    # f32 MXU operands; only the approx reciprocal loosens the tolerance a bit.
    assert jnp.allclose(out, ref, atol=1e-2, rtol=1e-2), float(
        jnp.max(jnp.abs(out - ref)))

    print("KERNEL_OK")
</pallas_src>

<mosaic_0001>
module attributes {stable_mosaic.version = 11 : i64} {
  func.func @_mlp_kernel(%arg0: i32, %arg1: memref<128x16xf32, #tpu.memory_space<vmem>>, %arg2: memref<32x16xf32, #tpu.memory_space<vmem>>, %arg3: memref<32x1xf32, #tpu.memory_space<vmem>>, %arg4: memref<32x32xf32, #tpu.memory_space<vmem>>, %arg5: memref<32x1xf32, #tpu.memory_space<vmem>>, %arg6: memref<1x32xf32, #tpu.memory_space<vmem>>, %arg7: memref<1x1xf32, #tpu.memory_space<smem>>, %arg8: memref<1x128xf32, #tpu.memory_space<vmem>>) attributes {dimension_semantics = [#tpu.dimension_semantics<parallel>], iteration_bounds = array<i64: 2>, scalar_prefetch = 0 : i64, scratch_operands = 0 : i64, tpu.core_type = #tpu.core_type<tc>, window_params = [{transform_indices = @transform_0, window_bounds = array<i64: 128, 16>}, {pipeline_mode = #tpu.pipeline_mode<synchronous>, transform_indices = @transform_1, window_bounds = array<i64: 32, 16>}, {pipeline_mode = #tpu.pipeline_mode<synchronous>, transform_indices = @transform_2, window_bounds = array<i64: 32, 1>}, {pipeline_mode = #tpu.pipeline_mode<synchronous>, transform_indices = @transform_3, window_bounds = array<i64: 32, 32>}, {pipeline_mode = #tpu.pipeline_mode<synchronous>, transform_indices = @transform_4, window_bounds = array<i64: 32, 1>}, {pipeline_mode = #tpu.pipeline_mode<synchronous>, transform_indices = @transform_5, window_bounds = array<i64: 1, 32>}, {transform_indices = @transform_6, window_bounds = array<i64: 1, 1>}, {transform_indices = @transform_7, window_bounds = array<i64: 1, 128>}]} {
    %c0 = arith.constant 0 : index
    %c0_0 = arith.constant 0 : index
    %0 = vector.load %arg1[%c0, %c0_0] : memref<128x16xf32, #tpu.memory_space<vmem>>, vector<128x16xf32>
    %c0_1 = arith.constant 0 : index
    %c0_2 = arith.constant 0 : index
    %1 = vector.load %arg2[%c0_1, %c0_2] : memref<32x16xf32, #tpu.memory_space<vmem>>, vector<32x16xf32>
    %cst = arith.constant dense<0.000000e+00> : vector<32x128xf32>
    %2 = tpu.matmul %1, %0, %cst {dimension_numbers = #tpu.dot_dimension_numbers<[1], [1], [0], [0], [0, 0, 1, 0], [], []>} : vector<32x16xf32>, vector<128x16xf32>, vector<32x128xf32> -> vector<32x128xf32>
    %c0_3 = arith.constant 0 : index
    %c0_4 = arith.constant 0 : index
    %3 = vector.load %arg3[%c0_3, %c0_4] : memref<32x1xf32, #tpu.memory_space<vmem>>, vector<32x1xf32>
    %4 = vector.broadcast %3 : vector<32x1xf32> to vector<32x128xf32>
    %5 = arith.addf %2, %4 : vector<32x128xf32>
    %6 = math.tanh %5 : vector<32x128xf32>
    %c0_5 = arith.constant 0 : index
    %c0_6 = arith.constant 0 : index
    %7 = vector.load %arg4[%c0_5, %c0_6] : memref<32x32xf32, #tpu.memory_space<vmem>>, vector<32x32xf32>
    %cst_7 = arith.constant dense<0.000000e+00> : vector<32x128xf32>
    %8 = tpu.matmul %7, %6, %cst_7 {dimension_numbers = #tpu.dot_dimension_numbers<[1], [0], [0], [1], [0, 0, 1, 1], [], []>} : vector<32x32xf32>, vector<32x128xf32>, vector<32x128xf32> -> vector<32x128xf32>
    %c0_8 = arith.constant 0 : index
    %c0_9 = arith.constant 0 : index
    %9 = vector.load %arg5[%c0_8, %c0_9] : memref<32x1xf32, #tpu.memory_space<vmem>>, vector<32x1xf32>
    %10 = vector.broadcast %9 : vector<32x1xf32> to vector<32x128xf32>
    %11 = arith.addf %8, %10 : vector<32x128xf32>
    %12 = math.tanh %11 : vector<32x128xf32>
    %c0_10 = arith.constant 0 : index
    %c0_11 = arith.constant 0 : index
    %13 = vector.load %arg6[%c0_10, %c0_11] : memref<1x32xf32, #tpu.memory_space<vmem>>, vector<1x32xf32>
    %cst_12 = arith.constant dense<0.000000e+00> : vector<1x128xf32>
    %14 = tpu.matmul %13, %12, %cst_12 {dimension_numbers = #tpu.dot_dimension_numbers<[1], [0], [0], [1], [0, 0, 1, 1], [], []>} : vector<1x32xf32>, vector<32x128xf32>, vector<1x128xf32> -> vector<1x128xf32>
    %c0_13 = arith.constant 0 : index
    %c0_14 = arith.constant 0 : index
    %15 = memref.load %arg7[%c0_13, %c0_14] : memref<1x1xf32, #tpu.memory_space<smem>>
    %16 = vector.broadcast %15 : f32 to vector<1x128xf32>
    %17 = arith.addf %14, %16 : vector<1x128xf32>
    %cst_15 = arith.constant 0.000000e+00 : f32
    %18 = vector.broadcast %cst_15 : f32 to vector<1x128xf32>
    %19 = arith.subf %18, %17 : vector<1x128xf32>
    %20 = math.exp %19 : vector<1x128xf32>
    %cst_16 = arith.constant 1.000000e+00 : f32
    %21 = vector.broadcast %cst_16 : f32 to vector<1x128xf32>
    %22 = arith.addf %21, %20 : vector<1x128xf32>
    %23 = tpu.reciprocal %22 {approx = true} : vector<1x128xf32> -> vector<1x128xf32>
    %c0_17 = arith.constant 0 : index
    %c0_18 = arith.constant 0 : index
    %24 = vector.load %arg8[%c0_17, %c0_18] : memref<1x128xf32, #tpu.memory_space<vmem>>, vector<1x128xf32>
    tpu.vector_store %arg8[%c0_17, %c0_18], %23 {strides = array<i32>} : memref<1x128xf32, #tpu.memory_space<vmem>>, vector<1x128xf32>,
    return
  }
  func.func @transform_0(%arg0: i32) -> (i32, i32) {
    %c0_i32 = arith.constant 0 : i32
    %c0_i32_0 = arith.constant 0 : i32
    return %arg0, %c0_i32 : i32, i32
  }
  func.func @transform_1(%arg0: i32) -> (i32, i32) {
    %c0_i32 = arith.constant 0 : i32
    %c0_i32_0 = arith.constant 0 : i32
    %c0_i32_1 = arith.constant 0 : i32
    return %c0_i32, %c0_i32_0 : i32, i32
  }
  func.func @transform_2(%arg0: i32) -> (i32, i32) {
    %c0_i32 = arith.constant 0 : i32
    %c0_i32_0 = arith.constant 0 : i32
    %c0_i32_1 = arith.constant 0 : i32
    return %c0_i32, %c0_i32_0 : i32, i32
  }
  func.func @transform_3(%arg0: i32) -> (i32, i32) {
    %c0_i32 = arith.constant 0 : i32
    %c0_i32_0 = arith.constant 0 : i32
    %c0_i32_1 = arith.constant 0 : i32
    return %c0_i32, %c0_i32_0 : i32, i32
  }
  func.func @transform_4(%arg0: i32) -> (i32, i32) {
    %c0_i32 = arith.constant 0 : i32
    %c0_i32_0 = arith.constant 0 : i32
    %c0_i32_1 = arith.constant 0 : i32
    return %c0_i32, %c0_i32_0 : i32, i32
  }
  func.func @transform_5(%arg0: i32) -> (i32, i32) {
    %c0_i32 = arith.constant 0 : i32
    %c0_i32_0 = arith.constant 0 : i32
    %c0_i32_1 = arith.constant 0 : i32
    return %c0_i32, %c0_i32_0 : i32, i32
  }
  func.func @transform_6(%arg0: i32) -> (i32, i32) {
    %c0_i32 = arith.constant 0 : i32
    %c0_i32_0 = arith.constant 0 : i32
    %c0_i32_1 = arith.constant 0 : i32
    return %c0_i32, %c0_i32_0 : i32, i32
  }
  func.func @transform_7(%arg0: i32) -> (i32, i32) {
    %c0_i32 = arith.constant 0 : i32
    %c0_i32_0 = arith.constant 0 : i32
    return %c0_i32, %arg0 : i32, i32
  }
}

</mosaic_0001>

<bundles_post_ra>
// kernel: tpu_custom_call.1
= control target key start
LH: loop header
LB: loop body
LE: loop exit
PB: predicated region body
PF: predicated region fallthrough
CT: control target
= control target key end

     0   :  { %s1337_s0 = inlined_call_operand.vmem [shape: f32[256,16], index: 0, kind: input, shape index: {}]   ;;  %s1338_s1 = inlined_call_operand.vmem [shape: f32[32,16], index: 1, kind: input, shape index: {}]   ;;  %s1339_s2 = inlined_call_operand.vmem [shape: f32[32,1], index: 2, kind: input, shape index: {}]   ;;  %s1340_s3 = inlined_call_operand.vmem [shape: f32[32,32], index: 3, kind: input, shape index: {}]   ;;  %s1341_s4 = inlined_call_operand.vmem [shape: f32[32,1], index: 4, kind: input, shape index: {}]   ;;  %s1342_s5 = inlined_call_operand.vmem [shape: f32[1,32], index: 5, kind: input, shape index: {}]   ;;  %s1343_s6 = inlined_call_operand.<no memory space> [shape: f32[1,1], index: 6, kind: input, shape index: {}]   ;;  %s1344_s7 = inlined_call_operand.hbm [shape: f32[1,256], index: 7, kind: output, shape index: {}]  }
   0x1   :  { %12 = sst [smem:[#allocation2]] %s1343_s6 }
   0x2   :  { %13 = vsyncpa [#allocation4], 0 }
   0x3   :  { %15 = vsyncpa [#allocation4 + $0x1], 0  ;;  %s1122_s26 = smov 0   ;;  %s1124_s27 = smov 0  }
   0x4   :  { %s1126_s28 = smov 0   ;;  %s1128_s29 = smov 0  }
   0x5 LB: > { %s752_s6 = sadd.s32 4294967295, %s1072_s29   ;;  %s753_s30 = sadd.s32 4294967294, %s1072_s29   ;;  %s1072_s29 = sphi %s1128_s29, %s1352_s29   ;;  %s1068_s28 = sphi %s1126_s28, %s1351_s28   ;;  %s1064_s27 = sphi %s1124_s27, %s1350_s27   ;;  %s1060_s26 = sphi %s1122_s26, %s1349_s26  }
   0x6   : > { %s1145_s8 = sadd.s32 1, %s1072_s29   ;;  %s180_s9 = sadd.s32 1, %s1068_s28 }
   0x7   : > { %s177_s10 = ssub.s32 %s1072_s29, %s1145_s8  ;;  %p190_p0 = scmp.ne.s32.totalorder %s1068_s28, %s1064_s27 }
   0x8   : > { %p178_p1 = scmp.eq.s32.totalorder %s177_s10, 0  ;;  %p191_p2 = scmp.eq.s32.totalorder %s752_s6, 1 }
   0x9   : > { %p196_p3 = scmp.ne.s32.totalorder %s1064_s27, %s1060_s26  ;;  %p197_p4 = scmp.eq.s32.totalorder %s753_s30, 1 }
   0xa   : > { %s1155_s11 = scalar_select %p178_p1, %s1068_s28, %s180_s9  }
   0xb   : > { %p1157_p5 = por %p191_p2, %p190_p0  ;;  %p1161_p6 = por %p197_p4, %p196_p3 }
   0xc   : > { %p756_p7 = scmp.ge.s32.totalorder %s1072_s29, 1  ;;  %p242_p8 = scmp.lt.s32.totalorder %s1072_s29, 3 }
   0xe   : > { %p243_p9 = pnand %p756_p7, %p242_p8 }
   0xf   : > { %s1167_s14 = sshll.u32 (!%p243_p9), %s752_s6, 4  ;;  %vm323_vm0 = vcmask (!%p243_p9), 130048   ;;  %v295_v0 = vld [vmem:[%s1338_s1] sm:$0xff] (!%p243_p9)  ;;  %v1074_v1 = vmov (!%p243_p9), 0   ;;  %v301_v3 = vld [vmem:[%s1339_s2 + $0x10] sm:$0xff] (!%p243_p9)  ;;  %v300_v4 = vld [vmem:[%s1339_s2 + $0x8] sm:$0xff] (!%p243_p9) }
  0x10   : > { %246 = sbr.rel (%p243_p9) target bundleno = 821 (0x335), region = 48  ;;  %p274_p10 = scmp.lt.s32.totalorder (!%p243_p9), %s1167_s14, 31  ;;  %852 = vmatprep.mubr.msk.f32.mxu0 (!%p243_p9), %vm323_vm0, %v295_v0  ;;  %988 = vset.pattern.permute.xlu0 (!%p243_p9), %v1074_v1  ;;  %v299_v2 = vld [vmem:[%s1339_s2] sm:$0xff] (!%p243_p9)  ;;  %v302_v5 = vld [vmem:[%s1339_s2 + $0x18] sm:$0xff] (!%p243_p9)  ;;  %vm1194_vm1 = vmpackc.low (!%p243_p9), %vm323_vm0, %vm323_vm0  ;;  %vm501_vm2 = vcmask (!%p243_p9), 261120   ;;  %v1075_v60 = vmov (!%p243_p9), 0.0|0.0  }
  0x11   : > { %305 = vperm.xlu0 (!%p243_p9), %988, %v299_v2   ;;  %989 = vset.pattern.permute.xlu1 (!%p243_p9), %v1074_v1  ;;  %v477_v7 = vld [vmem:[%s1341_s4] sm:$0xff] (!%p243_p9)  ;;  %v478_v13 = vld [vmem:[%s1341_s4 + $0x8] sm:$0xff] (!%p243_p9)  ;;  %v479_v15 = vld [vmem:[%s1341_s4 + $0x10] sm:$0xff] (!%p243_p9)  ;;  %vm1076_vm3 = vmmov (!%p243_p9), 0   ;;  %v1077_v61 = vmov (!%p243_p9), 0.0   ;;  %s604_s24 = sld [smem:[#allocation2]] (!%p243_p9)  ;;  %s1295_s15 = scalar_lea.hbm (!%p243_p9), %s1344_s7, %s1167_s14 }
  0x12   : > { %315 = vperm.xlu1 (!%p243_p9), %989, %v301_v3   ;;  %v480_v16 = vld [vmem:[%s1341_s4 + $0x18] sm:$0xff] (!%p243_p9)  ;;  %v296_v35 = vld [vmem:[%s1338_s1 + $0x8] sm:$0xff] (!%p243_p9)  ;;  %v297_v36 = vld [vmem:[%s1338_s1 + $0x10] sm:$0xff] (!%p243_p9)  ;;  %s271_s25 = sand.u32 (!%p243_p9), 1, %s1064_s27   ;;  %s1078_s18 = smov (!%p243_p9), [#allocation3]  }
  0x13   : > { %v298_v37 = vld [vmem:[%s1338_s1 + $0x18] sm:$0xff] (!%p243_p9)  ;;  %v473_v38 = vld [vmem:[%s1340_s3] sm:$0xff] (!%p243_p9)  ;;  %v474_v57 = vld [vmem:[%s1340_s3 + $0x8] sm:$0xff] (!%p243_p9)  ;;  %s686_s16 = scalar_lea.sflag (!%p243_p9), [#allocation4], %s271_s25  ;;  %s1014_s19 = sshll.u32 (!%p243_p9), %s1078_s18, 4  ;;  %s1015_s19 = int_to_ptr.vmem [resolvable:$false] %s1014_s19 }
  0x14   : > { %866 = vmatprep.mubr.msk.f32.mxu1 (!%p243_p9), %vm501_vm2, %v473_v38  ;;  %v475_v58 = vld [vmem:[%s1340_s3 + $0x10] sm:$0xff] (!%p243_p9)  ;;  %v476_v59 = vld [vmem:[%s1340_s3 + $0x18] sm:$0xff] (!%p243_p9)  ;;  %s1016_s20 = scalar_lea.vmem (!%p243_p9), %s1015_s19, 32 }
  0x15   : > { %310 = vperm.xlu0 (!%p243_p9), %988, %v300_v4  }
  0x16   : > { %320 = vperm.xlu1 (!%p243_p9), %989, %v302_v5  }
  0x17   : > { %s275_s21 = scalar_select %p274_p10, %s1167_s14, 31 }
  0x19   : > { %s758_s6 = sshll.u32 %s275_s21, 3  ;;  %483 = vperm.xlu0 %988, %v477_v7  }
  0x1a   : > { %s1190_s10 = scalar_lea.vmem %s1337_s0, %s758_s6  ;;  %488 = vperm.xlu1 %989, %v478_v13   ;;  %s272_s6 = scalar_lea.vmem [#allocation3], %s271_s25 }
  0x1b   : > { %v279_v8 = vld [vmem:[%s1190_s10] sm:$0xff]  ;;  %v280_v9 = vld [vmem:[%s1190_s10 + $0x8] sm:$0xff]  ;;  %v281_v10 = vld [vmem:[%s1190_s10 + $0x10] sm:$0xff]  ;;  %s698_s30 = sshll.u32 %s272_s6, 4  ;;  %s1297_s30 = int_to_ptr.vmem [resolvable:$true] %s698_s30 }
  0x1c   : > { %v883_v11 = vpack.c.bf16 %v280_v9, %v279_v8  ;;  %v282_v12 = vld [vmem:[%s1190_s10 + $0x18] sm:$0xff]  ;;  %v283_v17 = vld [vmem:[%s1190_s10 + $0x20] sm:$0xff]  ;;  %v284_v18 = vld [vmem:[%s1190_s10 + $0x28] sm:$0xff]  ;;  %s1010_s17 = scalar_lea.vmem %s1297_s30, 16  ;;  %p1017_p0 = scmp.lt.s32.totalorder %s1297_s30, %s1015_s19 }
  0x1d   : > { %v889_v14 = vpack.c.bf16 %v282_v12, %v281_v10  ;;  %493 = vperm.xlu0 %988, %v479_v15   ;;  %v895_v19 = vpack.c.bf16 %v284_v18, %v283_v17  ;;  %v285_v20 = vld [vmem:[%s1190_s10 + $0x30] sm:$0xff]  ;;  %v286_v21 = vld [vmem:[%s1190_s10 + $0x38] sm:$0xff]  ;;  %v287_v23 = vld [vmem:[%s1190_s10 + $0x40] sm:$0xff]  ;;  %v605_v17 = vstv %s604_s24  ;;  %p1011_p11 = scmp.ne.s32.totalorder %s1297_s30, %s1010_s17  ;;  %p1018_p1 = scmp.lt.s32.totalorder %s1016_s20, %s1010_s17 }
  0x1e   : > { %885 = vmatprep.subr.msk.bf16.mxu0 %vm1194_vm1, %v883_v11  ;;  %498 = vperm.xlu1 %989, %v480_v16   ;;  %v901_v22 = vpack.c.bf16 %v286_v21, %v285_v20  ;;  %v288_v24 = vld [vmem:[%s1190_s10 + $0x48] sm:$0xff]  ;;  %v289_v26 = vld [vmem:[%s1190_s10 + $0x50] sm:$0xff]  ;;  %v290_v27 = vld [vmem:[%s1190_s10 + $0x58] sm:$0xff] }
  0x1f   : > { %888 = vmatpush3.bf16.xpose.msk.msra.mxu0 %vm1194_vm1, %v883_v11  ;;  %v907_v25 = vpack.c.bf16 %v288_v24, %v287_v23  ;;  %v913_v28 = vpack.c.bf16 %v290_v27, %v289_v26  ;;  %v291_v29 = vld [vmem:[%s1190_s10 + $0x60] sm:$0xff]  ;;  %v292_v30 = vld [vmem:[%s1190_s10 + $0x68] sm:$0xff]  ;;  %v293_v32 = vld [vmem:[%s1190_s10 + $0x70] sm:$0xff]  ;;  %p1012_p12 = pnand %p1011_p11, %p1157_p5  ;;  %p1019_p2 = por %p1018_p1, %p1017_p0 }
  0x20   : > { %891 = vmatprep.subr.msk.bf16.mxu0 %vm1194_vm1, %v889_v14  ;;  %v919_v31 = vpack.c.bf16 %v292_v30, %v291_v29  ;;  %v294_v33 = vld [vmem:[%s1190_s10 + $0x78] sm:$0xff]  ;;  %v603_v16 = vld [vmem:[%s1342_s5] sm:$0x1] }
  0x21   : > { %v925_v34 = vpack.c.bf16 %v294_v33, %v293_v32  ;;  %p1013_p13 = pneg %p1012_p12 }
  0x23   : > { %p1020_p3 = pnand %p1019_p2, %p1013_p13 }
  0x27   : > { %894 = vmatpush3.bf16.xpose.msk.msra.mxu0 %vm1194_vm1, %v889_v14 }
  0x28   : > { %897 = vmatprep.subr.msk.bf16.mxu0 %vm1194_vm1, %v895_v19 }
  0x2f   : > { %900 = vmatpush3.bf16.xpose.msk.msra.mxu0 %vm1194_vm1, %v895_v19 }
  0x30   : > { %903 = vmatprep.subr.msk.bf16.mxu0 %vm1194_vm1, %v901_v22 }
  0x37   : > { %906 = vmatpush3.bf16.xpose.msk.msra.mxu0 %vm1194_vm1, %v901_v22 }
  0x38   : > { %909 = vmatprep.subr.msk.bf16.mxu0 %vm1194_vm1, %v907_v25 }
  0x3f   : > { %912 = vmatpush3.bf16.xpose.msk.msra.mxu0 %vm1194_vm1, %v907_v25 }
  0x40   : > { %915 = vmatprep.subr.msk.bf16.mxu0 %vm1194_vm1, %v913_v28 }
  0x47   : > { %918 = vmatpush3.bf16.xpose.msk.msra.mxu0 %vm1194_vm1, %v913_v28 }
  0x48   : > { %921 = vmatprep.subr.msk.bf16.mxu0 %vm1194_vm1, %v919_v31 }
  0x4f   : > { %924 = vmatpush3.bf16.xpose.msk.msra.mxu0 %vm1194_vm1, %v919_v31 }
  0x50   : > { %927 = vmatprep.subr.msk.bf16.mxu0 %vm1194_vm1, %v925_v34 }
  0x57   : > { %930 = vmatpush3.bf16.xpose.msk.msra.mxu0 %vm1194_vm1, %v925_v34 }
  0x5e   : > { %853 = vmatmul.mubr.msk.f32.vlgmr.msra.gmra.mrb[0].mxu0 %vm323_vm0, %v296_v35 }
  0x5f   : > { %855 = vmatprep.mubr.msk.f32.mxu0 %vm323_vm0, %v297_v36 }
  0x62   : > { %856 = vmatmul.mubr.msk.f32.gmra.mrb[2].mxu0 %vm323_vm0, %v298_v37 }
  0x90   : > { %v306_v39 = vpop.permute.xlu0 %305 }
  0x91   : > { %v316_v40 = vpop.permute.xlu1 %315 }
  0x94   : > { %v311_v41 = vpop.permute.xlu0 %310 }
  0x95   : > { %v321_v46 = vpop.permute.xlu1 %320 }
  0x98   : > { %v484_v63 = vpop.permute.xlu0 %483 }
  0x99   : > { %v489_v62 = vpop.permute.xlu1 %488 }
  0x9c   : > { %v494_v6 = vpop.permute.xlu0 %493 }
  0x9d   : > { %v499_v4 = vpop.permute.xlu1 %498 }
 0x131   : > { %v854_v42 = vpop.f32.mrb[0].mxu0 }
 0x132   : > { %v456_v43 = vadd.f32 %v854_v42, %v311_v41  ;;  %v450_v44 = vpop.f32.mrb[1].mxu0 }
 0x133   : > { %v451_v45 = vadd.f32 %v450_v44, %v306_v39 }
 0x134   : > { %990 = vtanh.f32 %v456_v43 }
 0x135   : > { %992 = vtanh.f32 %v451_v45  ;;  %v857_v47 = vpop.f32.mrb[2].mxu0 }
 0x136   : > { %v466_v48 = vadd.f32 %v857_v47, %v321_v46  ;;  %v460_v49 = vpop.f32.mrb[3].mxu0 }
 0x137   : > { %v461_v50 = vadd.f32 %v460_v49, %v316_v40 }
 0x138   : > { %994 = vtanh.f32 %v466_v48 }
 0x139   : > { %996 = vtanh.f32 %v461_v50 }
 0x13e   : > { %v991_v51 = vpop.eup %990 }
 0x13f   : > { %v993_v52 = vpop.eup %992 }
 0x140   : > { %v931_v53 = vpack.c.bf16 %v991_v51, %v993_v52 }
 0x142   : > { %v995_v54 = vpop.eup %994  ;;  %932 = vmatprep.subr.bf16.mxu1 %v931_v53 }
 0x143   : > { %v997_v55 = vpop.eup %996  ;;  %934 = vmatpush3.bf16.msra.mxu1 %v931_v53 }
 0x144   : > { %v935_v56 = vpack.c.bf16 %v995_v54, %v997_v55 }
 0x146   : > { %936 = vmatprep.subr.bf16.mxu1 %v935_v56 }
 0x147   : > { %938 = vmatpush3.bf16.msra.mxu1 %v935_v56 }
 0x148   : > { %939 = vmatprep.subr.bf16.mxu1 %v1075_v60 }
 0x14a   : > { %867 = vmatmul.mubr.msk.f32.vlgmr.msra.gmra.mrb[0].mxu1 %vm501_vm2, %v474_v57 }
 0x14b   : > { %869 = vmatprep.mubr.msk.f32.mxu1 %vm501_vm2, %v475_v58 }
 0x14e   : > { %870 = vmatmul.mubr.msk.f32.gmra.mrb[2].mxu1 %vm501_vm2, %v476_v59 }
 0x14f   : > { %880 = vmatprep.mubr.msk.f32.mxu1 %vm1076_vm3, %v1077_v61 }
 0x21d   : > { %v868_v0 = vpop.f32.mrb[0].mxu1 }
 0x21e   : > { %v586_v1 = vadd.f32 %v868_v0, %v489_v62  ;;  %v580_v2 = vpop.f32.mrb[1].mxu1 }
 0x21f   : > { %v581_v3 = vadd.f32 %v580_v2, %v484_v63 }
 0x220   : > { %998 = vtanh.f32 %v586_v1 }
 0x221   : > { %1000 = vtanh.f32 %v581_v3  ;;  %v871_v5 = vpop.f32.mrb[2].mxu1 }
 0x222   : > { %v596_v7 = vadd.f32 %v871_v5, %v499_v4  ;;  %v590_v8 = vpop.f32.mrb[3].mxu1 }
 0x223   : > { %v591_v9 = vadd.f32 %v590_v8, %v494_v6 }
 0x224   : > { %1002 = vtanh.f32 %v596_v7 }
 0x225   : > { %1004 = vtanh.f32 %v591_v9 }
 0x22a   : > { %v999_v10 = vpop.eup %998 }
 0x22b   : > { %v1001_v11 = vpop.eup %1000 }
 0x22c   : > { %v940_v12 = vpack.c.bf16 %v999_v10, %v1001_v11 }
 0x22e   : > { %v1003_v13 = vpop.eup %1002  ;;  %941 = vmatpush3.bf16.msra.mxu1 %v940_v12 }
 0x22f   : > { %v1005_v14 = vpop.eup %1004  ;;  %942 = vmatprep.subr.bf16.mxu1 %v1075_v60 }
 0x230   : > { %v943_v15 = vpack.c.bf16 %v1003_v13, %v1005_v14 }
 0x232   : > { %944 = vmatpush3.bf16.msra.mxu1 %v943_v15 }
 0x235   : > { %881 = vmatmul.mubr.msk.f32.vlgmr.msra.gmra.mrb[4].mxu1 %vm501_vm2, %v603_v16 }
 0x308   : > { %v675_v18 = vpop.f32.mrb[4].mxu1 }
 0x309   : > { %v676_v19 = vadd.f32 %v675_v18, %v605_v17  ;;  %v882_v20 = vpop.f32.mrb[5].mxu1 }
 0x30b   : > { %v679_v21 = vsub.f32 0.0, %v676_v19 }
 0x30d   : > { %v680_v22 = vmul.f32 1.442695, %v679_v21 }
 0x30f   : > { %1006 = vpow2.f32 %v680_v22 }
 0x319   : > { %v1007_v23 = vpop.eup %1006 }
 0x31a   : > { %v682_v24 = vadd.f32 1.0, %v1007_v23 }
 0x31c   : > { %1008 = vrcp.f32 %v682_v24 }
 0x326   : > { %v1009_v25 = vpop.eup %1008 }
 0x327   : > { %684 = vst [vmem:[%s272_s6] sm:$0x1] %v1009_v25 }
 0x328   : > { %1023 = shalt.err (!%p1020_p3)
}
 0x329   : > { %s1024_s14 = scalar_lea.hbm %s1295_s15, 16  ;;  %s1028_s23 = scalar_lea.hbm %s1344_s7, 32 }
 0x32a   : > { %p1025_p4 = scmp.ne.s32.totalorder %s1295_s15, %s1024_s14  ;;  %p1029_p9 = scmp.lt.u32.totalorder %s1295_s15, %s1344_s7 }
 0x32b   : > { %p1030_p10 = scmp.lt.u32.totalorder %s1028_s23, %s1024_s14  ;;  %p1032_p12 = scmp.lt.u32.totalorder %s1024_s14, %s1295_s15 }
 0x32c   : > { %p1026_p7 = pnand %p1025_p4, %p1157_p5 }
 0x32d   : > { %p1031_p11 = por %p1030_p10, %p1029_p9 }
 0x32e   : > { %p1027_p8 = pneg %p1026_p7 }
 0x32f   : > { %p1033_p13 = por %p1032_p12, %p1031_p11 }
 0x331   : > { %p1034_p0 = pnand %p1033_p13, %p1027_p8 }
 0x333   : > { %1037 = shalt.err (!%p1034_p0)
}
 0x334   : > { %945 = dma.vmem_to_hbm [thread:$0]  (%p1157_p5), %s1297_s30, 16, %s1295_s15, %s686_s16  }
 0x335 PF: > { %p951_p1 = scmp.ge.s32.totalorder %s1072_s29, 2  ;;  %s710_s6 = sand.u32 1, %s1060_s26  }
 0x336   : > { %s711_s9 = scalar_lea.sflag [#allocation4], %s710_s6 }
 0x337   : > { %p948_p2 = pnand %p951_p1, %p1161_p6 }
 0x339   : > { %1055 = dma.done.wait (!%p948_p2), %s711_s9, 16  }
 0x33a   : > { %1057 = vsyncadd (!%p948_p2), %s711_s9, 4294967280  ;;  %p18_p3 = scmp.ge.s32.totalorder %s1145_s8, 4   ;;  %s1349_s26 = smov %s1064_s27 }
 0x33b   : > { %s1350_s27 = smov %s1068_s28  ;;  %s1351_s28 = smov %s1155_s11 }
 0x33c   : > { %s1352_s29 = smov %s1145_s8  ;;  %20 = sbr.rel (!%p18_p3) target bundleno = 5 (0x5), region = 83 }
 0x343   :  { %715 = vsyncpa [#allocation4], 1 }
 0x344   :  { %717 = vsyncpa [#allocation4 + $0x1], 1 }

</bundles_post_ra>
